<compile_context>
chip_gen: v7x
topology: tpu7x:2x2x1
jax: 0.10.0
libtpu: 0.0.40
codegen_flags: <defaults>
</compile_context>

<pallas_src>
from functools import partial

import jax
import jax.numpy as jnp
from jax.experimental import pallas as pl
from jax.experimental.pallas import tpu as pltpu


def _round_up(x, m):
    return ((x + m - 1) // m) * m


def _cdiv(a, b):
    return (a + b - 1) // b


def _tpu_generation():
    """Best-effort TPU generation (4/5/6/7). Unknown -> 7 (smallest VMEM)."""
    try:
        kind = jax.devices()[0].device_kind.lower()
    except Exception:
        return 7
    for g in (4, 5, 6, 7):
        if f"v{g}" in kind or f"tpu{g}" in kind:
            return g
    return 7


# ---------------------------------------------------------------- kernels ---
def _conv_gemm_kernel(x_ref, w_ref, b_ref, o_ref):
    """One (row-tile, cout-tile) block of the strided 3x3 conv as a GEMM.

    x_ref : (tm, 9*Cin)  bf16 im2col patch rows, rows ordered (n, ho, wo).
    w_ref : (9*Cin, tn)  bf16 weights, K ordered (ky, kx, cin).
    b_ref : (1, tn)      f32 bias.
    o_ref : (tm, tn)     f32 output tile.
    """
    o_ref[...] = (
        jnp.dot(x_ref[...], w_ref[...], preferred_element_type=jnp.float32)
        + b_ref[...]
    )


def _avgpool_kernel(xe_ref, xo_ref, p_ref, o_ref):
    """2x2/2 average pool on one (row-tile, col-tile) block.

    xe_ref / xo_ref : (tb, 2*tw)  even / odd input row of each output row.
    p_ref           : (2*tw, tw)  0/1 horizontal pair-sum matrix.
    o_ref           : (tb, tw).
    """
    s = xe_ref[...] + xo_ref[...]                    # VPU: vertical reduction
    o_ref[...] = (0.25 * jnp.dot(s, p_ref[...],
                                 preferred_element_type=jnp.float32)
                  ).astype(o_ref.dtype)


# --------------------------------------------------------------- wrappers ---
@partial(jax.jit, static_argnames=("compute_dtype",))
def downsample_conv(x, weight, bias, compute_dtype=jnp.bfloat16):
    """x: (N, Cin, H, W) f32; weight: (Cout, Cin, 3, 3); bias: (Cout,).

    Pass compute_dtype=jnp.float32 if bit-level parity with the f32 PyTorch
    Conv2d is required (bf16 is the fast inference default).
    """
    N, Cin, H, W = x.shape
    Cout = weight.shape[0]
    Ho = (H - 2) // 2 + 1                   # = floor((H+1-3)/2) + 1
    Wo = (W - 2) // 2 + 1
    gen = _tpu_generation()
    isz = jnp.dtype(compute_dtype).itemsize

    # ---- fused XLA pre-pass: bf16 NHWC im2col patches (M, 9*Cin) -----------
    xh = jnp.transpose(x.astype(compute_dtype), (0, 2, 3, 1))      # NHWC
    xh = jnp.pad(xh, ((0, 0), (0, 1), (0, 1), (0, 0)))             # pad r/b by 1
    cols = [xh[:, ky:ky + 2 * Ho:2, kx:kx + 2 * Wo:2, :]
            for ky in range(3) for kx in range(3)]
    M = N * Ho * Wo
    K = 9 * Cin
    patches = jnp.concatenate(cols, axis=-1).reshape(M, K)

    # ---- weights / bias: lane-dense Cout, per-generation N-tile ------------
    Coutp = _round_up(Cout, 128)
    tn = 128 if (gen <= 5 or Coutp % 256 != 0) else 256
    gn = Coutp // tn
    w_mat = jnp.transpose(weight, (2, 3, 1, 0)).reshape(K, Cout)
    w_mat = jnp.pad(w_mat, ((0, 0), (0, Coutp - Cout))).astype(compute_dtype)
    b_row = jnp.pad(bias.astype(jnp.float32), (0, Coutp - Cout)).reshape(1, Coutp)

    # ---- row tiling + VMEM budget (incl. in-kernel temporaries) ------------
    soft_cap = (44 << 20) if gen >= 7 else (88 << 20)
    hard_cap = (56 << 20) if gen >= 7 else (100 << 20)
    tm = min(512 if gen >= 7 else 1024, _round_up(M, 8))
    # Guarantee >=2 grid points on a "parallel" axis (v7x has 2 TensorCores).
    if gn == 1 and tm >= M and M > 8:
        tm = _round_up(_cdiv(M, 2), 8)

    def _need(t):
        # double-buffered in/out blocks + the in-flight f32 dot result
        return (2 * (t * K * isz + K * tn * isz + tn * 4 + t * tn * 4)
                + t * tn * 4)

    while _need(tm) > soft_cap and tm > 8:
        tm = max(8, _round_up(tm // 2, 8))
    # TODO(synk): for extreme Cin (K*tn alone near the VMEM cap) add a third
    # "arbitrary" grid axis over K chunks with a VMEM f32 accumulator.
    vmem_limit = int(min(hard_cap, max(32 << 20, _need(tm) + (2 << 20))))

    Mpad = _round_up(M, tm)
    patches = jnp.pad(patches, ((0, Mpad - M), (0, 0)))

    out = pl.pallas_call(
        _conv_gemm_kernel,
        out_shape=jax.ShapeDtypeStruct((Mpad, Coutp), jnp.float32),
        grid=(Mpad // tm, gn),
        in_specs=[
            pl.BlockSpec((tm, K), lambda i, j: (i, 0)),
            pl.BlockSpec((K, tn), lambda i, j: (0, j)),
            pl.BlockSpec((1, tn), lambda i, j: (0, j)),
        ],
        out_specs=pl.BlockSpec((tm, tn), lambda i, j: (i, j)),
        compiler_params=pltpu.CompilerParams(
            dimension_semantics=("parallel", "parallel"),
            vmem_limit_bytes=vmem_limit),
    )(patches, w_mat, b_row)

    out = out[:M, :Cout].reshape(N, Ho, Wo, Cout)
    # NOTE: if the consumer can take NHWC, return `out` here and skip the
    # lane<->sublane relayout pass below (review item: epilogue cost).
    return jnp.transpose(out, (0, 3, 1, 2))                        # NCHW


@jax.jit
def downsample_avgpool(x):
    """x: (N, C, H, W); 2x2 average pool, stride 2 (odd extents floored)."""
    N, C, H, W = x.shape
    Ho, Wo = H // 2, W // 2
    gen = _tpu_generation()
    dt = x.dtype
    isz = jnp.dtype(dt).itemsize

    x = x[:, :, :2 * Ho, :2 * Wo]
    M0 = N * C * Ho                                   # total output rows
    # Split each output row's input-row pair into even/odd planes so the
    # vertical reduction is a cheap in-kernel VPU add (halves the GEMM K).
    x2 = x.reshape(M0, 2, 2 * Wo)
    xe = x2[:, 0, :]                                  # (M0, 2*Wo)
    xo = x2[:, 1, :]

    # ---- output-column packing / tiling: lane-dense stores, bounded MACs ---
    if Wo >= 128:
        g = 1
        tw = 128                                      # column tile width
        cols_out = _round_up(Wo, tw)
        xe = jnp.pad(xe, ((0, 0), (0, 2 * (cols_out - Wo))))
        xo = jnp.pad(xo, ((0, 0), (0, 2 * (cols_out - Wo))))
        r = jnp.arange(2 * tw)
        c = jnp.arange(tw)
        pool = (r[:, None] // 2 == c[None, :]).astype(dt)   # periodic per tile
    else:
        # Pack g output rows per GEMM row.  2x2 windows never straddle rows,
        # so ANY divisor of N*C*Ho is valid (not just divisors of Ho).
        gmax = max(1, 256 // Wo)
        divs = [d for d in range(1, min(gmax, M0) + 1) if M0 % d == 0]
        lane_ok = [d for d in divs if d * Wo >= 128]
        g = min(lane_ok) if lane_ok else max(divs)
        tw = g * Wo
        cols_out = tw
        r = jnp.arange(2 * tw)
        c = jnp.arange(tw)
        pool = ((r[:, None] // (2 * Wo) == c[None, :] // Wo)
                & ((r[:, None] % (2 * Wo)) // 2 == c[None, :] % Wo)).astype(dt)

    Mp = M0 // g
    xe = xe.reshape(Mp, 2 * cols_out)
    xo = xo.reshape(Mp, 2 * cols_out)
    n_ct = cols_out // tw

    tb = min(512, _round_up(Mp, 8))
    # Guarantee >=2 grid points on a "parallel" axis when the problem allows.
    if n_ct * _cdiv(Mp, tb) < 2 and Mp > 8:
        tb = _round_up(_cdiv(Mp, 2), 8)
    Mp_pad = _round_up(Mp, tb)
    if Mp_pad != Mp:
        xe = jnp.pad(xe, ((0, Mp_pad - Mp), (0, 0)))
        xo = jnp.pad(xo, ((0, Mp_pad - Mp), (0, 0)))

    # Explicit VMEM budget: double-buffered blocks + in-kernel temporaries.
    need = (2 * (2 * tb * 2 * tw * isz + 2 * tw * tw * isz + tb * tw * isz)
            + tb * 2 * tw * 4 + tb * tw * 4)
    hard_cap = (56 << 20) if gen >= 7 else (100 << 20)
    vmem_limit = int(min(hard_cap, max(16 << 20, need + (2 << 20))))

    out = pl.pallas_call(
        _avgpool_kernel,
        out_shape=jax.ShapeDtypeStruct((Mp_pad, cols_out), dt),
        grid=(Mp_pad // tb, n_ct),
        in_specs=[
            pl.BlockSpec((tb, 2 * tw), lambda i, j: (i, j)),
            pl.BlockSpec((tb, 2 * tw), lambda i, j: (i, j)),
            pl.BlockSpec((2 * tw, tw), lambda i, j: (0, 0)),
        ],
        out_specs=pl.BlockSpec((tb, tw), lambda i, j: (i, j)),
        compiler_params=pltpu.CompilerParams(
            dimension_semantics=("parallel", "parallel"),
            vmem_limit_bytes=vmem_limit),
    )(xe, xo, pool)

    out = out[:Mp]
    if g == 1 and cols_out != Wo:
        out = out[:, :Wo]
    return out.reshape(N, C, Ho, Wo)                  # already NCHW


class DownsampleBlock:
    """JAX/Pallas port of the PyTorch DownsampleBlock (NCHW in / NCHW out)."""

    def __init__(self, in_channels, with_conv, key=None):
        self.with_conv = with_conv
        if self.with_conv:
            key = jax.random.PRNGKey(0) if key is None else key
            kw, kb = jax.random.split(key)
            fan_in = in_channels * 3 * 3
            bound = 1.0 / float(fan_in) ** 0.5        # torch Conv2d default init
            self.weight = jax.random.uniform(
                kw, (in_channels, in_channels, 3, 3), jnp.float32, -bound, bound)
            self.bias = jax.random.uniform(
                kb, (in_channels,), jnp.float32, -bound, bound)

    def __call__(self, x):
        if self.with_conv:
            return downsample_conv(x, self.weight, self.bias)
        return downsample_avgpool(x)


# ------------------------------------------------------------------- main ---
if __name__ == "__main__":
    key = jax.random.PRNGKey(0)
    kx, kp = jax.random.split(key)
    x = jax.random.normal(kx, (2, 4, 16, 16), jnp.float32)

    # with_conv=True path (pad right/bottom by 1, 3x3 conv stride 2)
    blk = DownsampleBlock(4, with_conv=True, key=kp)
    y = jax.block_until_ready(blk(x))
    ref = jax.lax.conv_general_dilated(
        x, blk.weight, window_strides=(2, 2), padding=((0, 1), (0, 1)),
        dimension_numbers=("NCHW", "OIHW", "NCHW")) + blk.bias.reshape(1, -1, 1, 1)
    assert y.shape == (2, 4, 8, 8), y.shape
    # bf16 MXU inputs with f32 accumulation -> loosened tolerance vs f32 ref.
    assert jnp.allclose(y, ref, atol=3e-2, rtol=3e-2), \
        float(jnp.max(jnp.abs(y - ref)))

    # with_conv=False path (2x2 average pool, stride 2), kept in f32
    blk2 = DownsampleBlock(4, with_conv=False)
    y2 = jax.block_until_ready(blk2(x))
    ref2 = jnp.mean(x.reshape(2, 4, 8, 2, 8, 2), axis=(3, 5))
    assert y2.shape == (2, 4, 8, 8), y2.shape
    assert jnp.allclose(y2, ref2, atol=1e-5, rtol=1e-5), \
        float(jnp.max(jnp.abs(y2 - ref2)))

    print("KERNEL_OK")
</pallas_src>

<mosaic_0001>
module attributes {stable_mosaic.version = 11 : i64} {
  func.func @_conv_gemm_kernel(%arg0: i32, %arg1: i32, %arg2: memref<64x36xbf16, #tpu.memory_space<vmem>>, %arg3: memref<36x128xbf16, #tpu.memory_space<vmem>>, %arg4: memref<1x128xf32, #tpu.memory_space<vmem>>, %arg5: memref<64x128xf32, #tpu.memory_space<vmem>>) attributes {dimension_semantics = [#tpu.dimension_semantics<parallel>, #tpu.dimension_semantics<parallel>], iteration_bounds = array<i64: 2, 1>, scalar_prefetch = 0 : i64, scratch_operands = 0 : i64, tpu.core_type = #tpu.core_type<tc>, window_params = [{transform_indices = @transform_0, window_bounds = array<i64: 64, 36>}, {transform_indices = @transform_1, window_bounds = array<i64: 36, 128>}, {transform_indices = @transform_2, window_bounds = array<i64: 1, 128>}, {transform_indices = @transform_3, window_bounds = array<i64: 64, 128>}]} {
    %c0 = arith.constant 0 : index
    %c0_0 = arith.constant 0 : index
    %0 = vector.load %arg2[%c0, %c0_0] : memref<64x36xbf16, #tpu.memory_space<vmem>>, vector<64x36xbf16>
    %c0_1 = arith.constant 0 : index
    %c0_2 = arith.constant 0 : index
    %1 = vector.load %arg3[%c0_1, %c0_2] : memref<36x128xbf16, #tpu.memory_space<vmem>>, vector<36x128xbf16>
    %cst = arith.constant dense<0.000000e+00> : vector<64x128xf32>
    %2 = tpu.matmul %0, %1, %cst {dimension_numbers = #tpu.dot_dimension_numbers<[1], [0], [0], [1], [0, 0, 1, 1], [], []>} : vector<64x36xbf16>, vector<36x128xbf16>, vector<64x128xf32> -> vector<64x128xf32>
    %c0_3 = arith.constant 0 : index
    %c0_4 = arith.constant 0 : index
    %3 = vector.load %arg4[%c0_3, %c0_4] : memref<1x128xf32, #tpu.memory_space<vmem>>, vector<1x128xf32>
    %4 = vector.broadcast %3 : vector<1x128xf32> to vector<64x128xf32>
    %5 = arith.addf %2, %4 : vector<64x128xf32>
    %c0_5 = arith.constant 0 : index
    %c0_6 = arith.constant 0 : index
    %6 = vector.load %arg5[%c0_5, %c0_6] : memref<64x128xf32, #tpu.memory_space<vmem>>, vector<64x128xf32>
    tpu.vector_store %arg5[%c0_5, %c0_6], %5 {strides = array<i32>} : memref<64x128xf32, #tpu.memory_space<vmem>>, vector<64x128xf32>,
    return
  }
  func.func @transform_0(%arg0: i32, %arg1: i32) -> (i32, i32) {
    %c0_i32 = arith.constant 0 : i32
    %c0_i32_0 = arith.constant 0 : i32
    return %arg0, %c0_i32 : i32, i32
  }
  func.func @transform_1(%arg0: i32, %arg1: i32) -> (i32, i32) {
    %c0_i32 = arith.constant 0 : i32
    %c0_i32_0 = arith.constant 0 : i32
    return %c0_i32, %arg1 : i32, i32
  }
  func.func @transform_2(%arg0: i32, %arg1: i32) -> (i32, i32) {
    %c0_i32 = arith.constant 0 : i32
    %c0_i32_0 = arith.constant 0 : i32
    return %c0_i32, %arg1 : i32, i32
  }
  func.func @transform_3(%arg0: i32, %arg1: i32) -> (i32, i32) {
    %c0_i32 = arith.constant 0 : i32
    return %arg0, %arg1 : i32, i32
  }
}

</mosaic_0001>

<bundles_post_ra>
// kernel: downsample_conv.1
= control target key start
LH: loop header
LB: loop body
LE: loop exit
PB: predicated region body
PF: predicated region fallthrough
CT: control target
= control target key end

     0   :  { %s602_s12 = smov 0   ;;  %s604_s13 = smov 0   ;;  %s647_s0 = inlined_call_operand.vmem [shape: bf16[128,36], index: 0, kind: input, shape index: {}]   ;;  %s648_s1 = inlined_call_operand.vmem [shape: bf16[36,128], index: 1, kind: input, shape index: {}]   ;;  %s649_s2 = inlined_call_operand.vmem [shape: f32[1,128], index: 2, kind: input, shape index: {}]   ;;  %s650_s3 = inlined_call_operand.vmem [shape: f32[128,128], index: 3, kind: output, shape index: {}]  }
   0x1   :  { %s606_s14 = smov 0  }
   0x2 LB: > { %s25_s15 = sadd.s32 1, %s576_s13  ;;  %p479_p0 = scmp.ge.s32.totalorder %s580_s14, 1  ;;  %s580_s14 = sphi %s606_s14, %s13_s14   ;;  %s576_s13 = sphi %s604_s13, %s652_s13   ;;  %s572_s12 = sphi %s602_s12, %s651_s12  }
   0x3   : > { %p27_p1 = scmp.ge.s32.totalorder %s25_s15, 2  ;;  %p169_p2 = scmp.lt.s32.totalorder %s580_s14, 3 }
   0x5   : > { %s654_s15 = smov (%p27_p1, %s25_s15), 0  ;;  %p170_p3 = pnand %p479_p0, %p169_p2 }
   0x6   : > { %v551_v0 = vld [vmem:[%s648_s1] sm:$0xff] (!%p170_p3)   ;;  %v552_v1 = vld [vmem:[%s648_s1 + $0x8] sm:$0xff] (!%p170_p3)   ;;  %s480_s20 = sshll.u32 (!%p170_p3), %s572_s12, 3  ;;  %v553_v2 = vld [vmem:[%s648_s1 + $0x10] ss:$0 sps:$4 sm:$0x33] (!%p170_p3)  }
   0x7   : > { %173 = sbr.rel (%p170_p3) target bundleno = 237 (0xed), region = 32  ;;  %505 = vmatprep.subr.bf16.mxu0 (!%p170_p3), %v551_v0  ;;  %519 = vmatprep.subr.bf16.mxu1 (!%p170_p3), %v551_v0  ;;  %p204_p4 = scmp.lt.s32.totalorder (!%p170_p3), %s480_s20, 15  ;;  %vm294_vm0 = vcmask (!%p170_p3), 1041408   ;;  %vm281_vm1 = vcmask (!%p170_p3), 293888   ;;  %v484_v8 = vld [vmem:[%s649_s2] ss:$0 sm:$0xff] (!%p170_p3) }
   0x8   : > { %506 = vmatpush3.bf16.msra.mxu0 (!%p170_p3), %v551_v0  ;;  %522 = vmatpush3.bf16.msra.mxu1 (!%p170_p3), %v551_v0  ;;  %v296_v3 = vsel (!%p170_p3), %vm294_vm0, %v553_v2, 0 }
   0x9   : > { %507 = vmatprep.subr.bf16.mxu0 (!%p170_p3), %v552_v1  ;;  %520 = vmatprep.subr.bf16.mxu1 (!%p170_p3), %v552_v1 }
   0xc   : > { %508 = vmatpush3.bf16.msra.mxu0 (!%p170_p3), %v552_v1  ;;  %523 = vmatpush3.bf16.msra.mxu1 (!%p170_p3), %v552_v1 }
   0xd   : > { %525 = vmatprep.subr.msk.bf16.mxu0 (!%p170_p3), %vm294_vm0, %v553_v2  ;;  %526 = vmatprep.subr.msk.bf16.mxu1 (!%p170_p3), %vm294_vm0, %v553_v2 }
   0xe   : > { %s656_s20 = smov (!%p204_p4, %s480_s20), 15 }
   0xf   : > { %s481_s23 = sshll.u32 %s656_s20, 2  ;;  %s483_s27 = sshll.u32 %s656_s20, 3 }
  0x10   : > { %s207_s26 = scalar_lea.vmem %s647_s0, %s481_s23  ;;  %510 = vmatpush3.bf16.msra.mxu0 %v296_v3  ;;  %524 = vmatpush3.bf16.msra.mxu1 %v296_v3  ;;  %s223_s5 = scalar_lea.vmem %s650_s3, %s483_s27 }
  0x11   : > { %v554_v4 = vld [vmem:[%s207_s26] sm:$0xff]   ;;  %v555_v5 = vld [vmem:[%s207_s26 + $0x10] sm:$0xff]   ;;  %v556_v6 = vld [vmem:[%s207_s26 + $0x8] sm:$0xff]  }
  0x12   : > { %511 = vmatprep.mubr.msk.bf16.mxu0 %vm281_vm1, %v554_v4  ;;  %v557_v7 = vld [vmem:[%s207_s26 + $0x18] sm:$0xff]   ;;  %515 = vmatprep.mubr.msk.bf16.mxu1 %vm281_vm1, %v555_v5 }
  0x13   : > { %512 = vmatmul.mubr.msk.bf16.vlgmr.msra.gmra.mrb[0].mxu0 %vm281_vm1, %v556_v6  ;;  %516 = vmatmul.mubr.msk.bf16.vlgmr.msra.gmra.mrb[0].mxu1 %vm281_vm1, %v557_v7 }
  0xe6   : > { %v513_v9 = vpop.f32.mrb[0].mxu0  ;;  %v517_v10 = vpop.f32.mrb[0].mxu1 }
  0xe7   : > { %v341_v11 = vadd.f32 %v513_v9, %v484_v8  ;;  %v357_v12 = vadd.f32 %v517_v10, %v484_v8  ;;  %v332_v13 = vpop.f32.mrb[1].mxu0  ;;  %v348_v14 = vpop.f32.mrb[1].mxu1 }
  0xe8   : > { %v333_v15 = vadd.f32 %v484_v8, %v332_v13  ;;  %v349_v16 = vadd.f32 %v484_v8, %v348_v14  ;;  %v514_v17 = vpop.f32.mrb[2].mxu0  ;;  %v518_v18 = vpop.f32.mrb[2].mxu1 }
  0xe9   : > { %365 = vst [vmem:[%s223_s5 + $0x10] sm:$0xff] %v341_v11  ;;  %369 = vst [vmem:[%s223_s5 + $0x30] sm:$0xff] %v357_v12  ;;  %v344_v19 = vadd.f32 %v514_v17, %v484_v8  ;;  %v360_v20 = vadd.f32 %v518_v18, %v484_v8  ;;  %v335_v21 = vpop.f32.mrb[3].mxu0  ;;  %v351_v22 = vpop.f32.mrb[3].mxu1 }
  0xea   : > { %363 = vst [vmem:[%s223_s5] sm:$0xff] %v333_v15  ;;  %367 = vst [vmem:[%s223_s5 + $0x20] sm:$0xff] %v349_v16  ;;  %v336_v23 = vadd.f32 %v484_v8, %v335_v21  ;;  %v352_v24 = vadd.f32 %v484_v8, %v351_v22 }
  0xeb   : > { %366 = vst [vmem:[%s223_s5 + $0x18] sm:$0xff] %v344_v19  ;;  %370 = vst [vmem:[%s223_s5 + $0x38] sm:$0xff] %v360_v20 }
  0xec   : > { %364 = vst [vmem:[%s223_s5 + $0x8] sm:$0xff] %v336_v23  ;;  %368 = vst [vmem:[%s223_s5 + $0x28] sm:$0xff] %v352_v24 }
  0xed PF: > { %s13_s14 = sadd.s32 1, %s580_s14   ;;  %s651_s12 = smov %s576_s13 }
  0xee   : > { %p10_p5 = scmp.ge.s32.totalorder %s13_s14, 4   ;;  %s652_s13 = smov %s654_s15 }
  0xf0   :  { %12 = sbr.rel (!%p10_p5) target bundleno = 2 (0x2), region = 68 }

</bundles_post_ra>
